<compile_context>
chip_gen: v7x
topology: tpu7x:2x2x1
jax: 0.10.0
libtpu: 0.0.40
codegen_flags: <defaults>
</compile_context>

<pallas_src>
import functools

import jax
import jax.numpy as jnp
from jax.experimental import pallas as pl
from jax.experimental.pallas import tpu as pltpu

_LANE = 128          # vreg lane count      (minor-dim granule)
_SUBLANE = 8         # vreg sublane count   (second-minor-dim granule)
_NEG_FILL = -1e30    # exp(_NEG_FILL) == 0.0f -> padded entries contribute 0
_VMEM_LIMIT_BYTES = 32 * 1024 * 1024   # safe scoped-VMEM on v5e/v6e/v7x


def _round_up(x, m):
    return (x + m - 1) // m * m


def _choose_tiles(batch, k, target_block_bytes):
    """Pick (tb, tk, padded_B, padded_K): ~target-sized, (8,128)-aligned tiles."""
    elem = 4  # f32
    # Largest lane extent such that even an 8-row block still fits the target.
    max_lanes = max(_LANE,
                    (target_block_bytes // (elem * _SUBLANE)) // _LANE * _LANE)
    if k <= max_lanes:
        tk, kp = k, k                       # whole-K rows, no K tiling needed
    else:
        tk = max_lanes                      # tile K too (huge negative sets)
        kp = _round_up(k, tk)
    rows = max(_SUBLANE,
               (target_block_bytes // (elem * tk)) // _SUBLANE * _SUBLANE)
    bp = _round_up(batch, _SUBLANE)
    tb = min(rows, bp)
    bp = _round_up(bp, tb)
    return tb, tk, bp, kp


# ---------------------------------------------------------------------------
# Small path: one fully fused kernel.  exp(scores_neg) evaluated exactly once;
# Z, lnPon, lnPmt and the final mean are all produced here -> output is the
# finished scalar loss (nothing left for XLA after the call).
# ---------------------------------------------------------------------------
def _fused_small_kernel(pos_ref, neg_ref, loss_ref, *, inv_batch):
    en = jnp.exp(neg_ref[...])                            # single EUP pass
    s = jnp.sum(en, keepdims=True)                        # (1,1) sum(exp(neg))
    kz = s * inv_batch                                    # (1,1) K*Z == sum/B
    # lnPon = -log(KZ/(en+KZ)) == log1p(en/KZ); reuses the cached exp.
    pon_sum = jnp.sum(jnp.log1p(en * (1.0 / kz)), keepdims=True)
    # lnPmt = -log(exp_pos/(exp_pos+KZ)) = softplus(log(KZ) - pos), stable form.
    zp = jnp.log(kz) - pos_ref[...]
    pmt = jnp.maximum(zp, 0.0) + jnp.log1p(jnp.exp(-jnp.abs(zp)))
    pmt_sum = jnp.sum(pmt, keepdims=True)
    loss_ref[...] = (pmt_sum + pon_sum) * inv_batch       # mean over batch


# ---------------------------------------------------------------------------
# Large path, pass 1: per-tile partial sums of exp(scores_neg).
# ---------------------------------------------------------------------------
def _zsum_kernel(neg_ref, part_ref):
    s = jnp.sum(jnp.exp(neg_ref[...]), keepdims=True)           # (1,1)
    part_ref[...] = jnp.broadcast_to(s, part_ref.shape)         # lane-dense


# ---------------------------------------------------------------------------
# Large path, pass 2: per-tile partial sums of lnPon in stable softplus form.
#   lnPon = -log(KZ/(exp(neg)+KZ)) = log1p(exp(neg - log(KZ)))
#         = max(z, 0) + log1p(exp(-|z|)),   z = neg - log(KZ)
# (no per-element divide, no exp overflow; padded entries contribute 0).
# ---------------------------------------------------------------------------
def _pon_kernel(logkz_ref, neg_ref, part_ref):
    z = neg_ref[...] - logkz_ref[0, 0]
    pon = jnp.maximum(z, 0.0) + jnp.log1p(jnp.exp(-jnp.abs(z)))
    s = jnp.sum(pon, keepdims=True)
    part_ref[...] = jnp.broadcast_to(s, part_ref.shape)


def nce_criterion_loss(scores_pos, scores_neg, nLem=4096, *,
                       target_block_bytes=4 * 1024 * 1024,
                       small_limit_bytes=2 * 1024 * 1024):
    """Pallas implementation of NCECriterion.forward (stateless first-call Z)."""
    del nLem  # only feeds Pnt/Pns in the reference, which are never used
    B, K = scores_neg.shape
    scores_pos = scores_pos.astype(jnp.float32).reshape(B, -1)
    scores_neg = scores_neg.astype(jnp.float32)

    tb, tk, Bp, Kp = _choose_tiles(B, K, target_block_bytes)
    if (Bp, Kp) != (B, K):
        # Pad with a huge negative fill: exp() underflows to exactly 0, so the
        # padded entries add 0 to both the Z sum and the lnPon sum.
        scores_neg = jnp.pad(scores_neg, ((0, Bp - B), (0, Kp - K)),
                             constant_values=_NEG_FILL)

    if Bp * Kp * 4 <= small_limit_bytes:
        # ------------- fully fused single-kernel path (fits in VMEM) --------
        loss_arr = pl.pallas_call(
            functools.partial(_fused_small_kernel, inv_batch=1.0 / B),
            out_shape=jax.ShapeDtypeStruct((1, 1), jnp.float32),
            grid=(1,),
            in_specs=[pl.BlockSpec(scores_pos.shape, lambda i: (0, 0)),
                      pl.BlockSpec((Bp, Kp), lambda i: (0, 0))],
            out_specs=pl.BlockSpec((1, 1), lambda i: (0, 0)),
            compiler_params=pltpu.CompilerParams(
                dimension_semantics=("arbitrary",),
                vmem_limit_bytes=_VMEM_LIMIT_BYTES),
        )(scores_pos, scores_neg)
        return loss_arr[0, 0]

    # ------------- tiled, fully parallel two-pass path -------------
    n_b, n_k = Bp // tb, Kp // tk
    grid = (n_b, n_k)
    neg_spec = pl.BlockSpec((tb, tk), lambda ib, ik: (ib, ik))
    # Each tile owns its own (8,128) output block (unmasked, lane-dense
    # stores, no cross-iteration accumulation) -> both axes "parallel".
    part_shape = jax.ShapeDtypeStruct((n_b * _SUBLANE, n_k * _LANE),
                                      jnp.float32)
    part_spec = pl.BlockSpec((_SUBLANE, _LANE), lambda ib, ik: (ib, ik))
    cparams = pltpu.CompilerParams(
        dimension_semantics=("parallel", "parallel"),
        vmem_limit_bytes=_VMEM_LIMIT_BYTES)

    z_parts = pl.pallas_call(
        _zsum_kernel, out_shape=part_shape, grid=grid,
        in_specs=[neg_spec], out_specs=part_spec,
        compiler_params=cparams,
    )(scores_neg)
    zsum = jnp.sum(z_parts[::_SUBLANE, ::_LANE])

    kz = zsum / B                     # K * Z  ==  sum(exp(neg)) / B
    log_kz_arr = jnp.log(kz).reshape(1, 1).astype(jnp.float32)
    pon_parts = pl.pallas_call(
        _pon_kernel, out_shape=part_shape, grid=grid,
        in_specs=[pl.BlockSpec(memory_space=pltpu.MemorySpace.SMEM),
                  neg_spec],
        out_specs=part_spec,
        compiler_params=cparams,
    )(log_kz_arr, scores_neg)
    pon_sum = jnp.sum(pon_parts[::_SUBLANE, ::_LANE])

    # lnPmt = softplus(log(KZ) - pos).  Only B scalars -> plain jnp (a
    # lane-sparse (tb,1) block inside the kernel would waste DMA/vregs).
    pmt_sum = jnp.sum(jax.nn.softplus(jnp.log(kz) - scores_pos))
    return (pmt_sum + pon_sum) / B


def _reference_loss(scores_pos, scores_neg):
    """Direct transcription of the PyTorch forward (first call, stateless)."""
    K = scores_neg.shape[1]
    ep = jnp.exp(scores_pos.astype(jnp.float32))
    en = jnp.exp(scores_neg.astype(jnp.float32))
    z = en.mean()
    ln_pmt = -jnp.log(ep / (ep + K * z)).sum(-1)
    ln_pon = -jnp.log((K * z) / (en + K * z)).sum(-1)
    return (ln_pmt + ln_pon).mean()


if __name__ == "__main__":
    key = jax.random.PRNGKey(0)
    k1, k2, k3, k4 = jax.random.split(key, 4)

    # Test 1: small shapes -> fully fused single-kernel (VMEM-resident) path.
    B, K = 16, 128
    scores_pos = 0.1 * jax.random.normal(k1, (B, 1), dtype=jnp.float32)
    scores_neg = 0.1 * jax.random.normal(k2, (B, K), dtype=jnp.float32)
    loss = jax.block_until_ready(nce_criterion_loss(scores_pos, scores_neg,
                                                    nLem=4096))
    ref = _reference_loss(scores_pos, scores_neg)
    assert jnp.allclose(loss, ref, rtol=1e-4, atol=1e-5), (loss, ref)

    # Test 2: force the tiled two-pass path (batch tiling, K tiling, padding)
    # with tiny block targets so the general streaming code path is exercised.
    B2, K2 = 20, 384
    scores_pos2 = 0.1 * jax.random.normal(k3, (B2, 1), dtype=jnp.float32)
    scores_neg2 = 0.1 * jax.random.normal(k4, (B2, K2), dtype=jnp.float32)
    loss2 = jax.block_until_ready(
        nce_criterion_loss(scores_pos2, scores_neg2, nLem=4096,
                           target_block_bytes=1024, small_limit_bytes=0))
    ref2 = _reference_loss(scores_pos2, scores_neg2)
    assert jnp.allclose(loss2, ref2, rtol=1e-4, atol=1e-5), (loss2, ref2)

    print("KERNEL_OK")
</pallas_src>

<mosaic_0001>
module attributes {stable_mosaic.version = 11 : i64} {
  func.func @_fused_small_kernel(%arg0: i32, %arg1: memref<16x1xf32, #tpu.memory_space<vmem>>, %arg2: memref<16x128xf32, #tpu.memory_space<vmem>>, %arg3: memref<1x1xf32, #tpu.memory_space<vmem>>) attributes {dimension_semantics = [#tpu.dimension_semantics<arbitrary>], iteration_bounds = array<i64: 1>, scalar_prefetch = 0 : i64, scratch_operands = 0 : i64, tpu.core_type = #tpu.core_type<tc>, window_params = [{pipeline_mode = #tpu.pipeline_mode<synchronous>, transform_indices = @transform_0, window_bounds = array<i64: 16, 1>}, {pipeline_mode = #tpu.pipeline_mode<synchronous>, transform_indices = @transform_1, window_bounds = array<i64: 16, 128>}, {pipeline_mode = #tpu.pipeline_mode<synchronous>, transform_indices = @transform_2, window_bounds = array<i64: 1, 1>}]} {
    %c0 = arith.constant 0 : index
    %c0_0 = arith.constant 0 : index
    %0 = vector.load %arg2[%c0, %c0_0] : memref<16x128xf32, #tpu.memory_space<vmem>>, vector<16x128xf32>
    %1 = math.exp %0 : vector<16x128xf32>
    %2 = vector.shape_cast %1 : vector<16x128xf32> to vector<1x16x128xf32>
    %cst = arith.constant dense<0.000000e+00> : vector<1xf32>
    %3 = vector.multi_reduction <add>, %2, %cst [1, 2] : vector<1x16x128xf32> to vector<1xf32>
    %4 = vector.shape_cast %3 : vector<1xf32> to vector<1x1x1xf32>
    %5 = vector.extract %4[0, 0, 0] : f32 from vector<1x1x1xf32>
    %6 = vector.broadcast %5 : f32 to vector<1x1xf32>
    %cst_1 = arith.constant 6.250000e-02 : f32
    %7 = vector.broadcast %cst_1 : f32 to vector<1x1xf32>
    %8 = arith.mulf %6, %7 : vector<1x1xf32>
    %cst_2 = arith.constant 1.000000e+00 : f32
    %9 = vector.broadcast %cst_2 : f32 to vector<1x1xf32>
    %10 = arith.divf %9, %8 : vector<1x1xf32>
    %11 = vector.broadcast %10 : vector<1x1xf32> to vector<16x128xf32>
    %12 = arith.mulf %1, %11 : vector<16x128xf32>
    %13 = math.log1p %12 : vector<16x128xf32>
    %14 = vector.shape_cast %13 : vector<16x128xf32> to vector<1x16x128xf32>
    %cst_3 = arith.constant dense<0.000000e+00> : vector<1xf32>
    %15 = vector.multi_reduction <add>, %14, %cst_3 [1, 2] : vector<1x16x128xf32> to vector<1xf32>
    %16 = vector.shape_cast %15 : vector<1xf32> to vector<1x1x1xf32>
    %17 = vector.extract %16[0, 0, 0] : f32 from vector<1x1x1xf32>
    %18 = vector.broadcast %17 : f32 to vector<1x1xf32>
    %19 = math.log %8 : vector<1x1xf32>
    %c0_4 = arith.constant 0 : index
    %c0_5 = arith.constant 0 : index
    %20 = vector.load %arg1[%c0_4, %c0_5] : memref<16x1xf32, #tpu.memory_space<vmem>>, vector<16x1xf32>
    %21 = vector.broadcast %19 : vector<1x1xf32> to vector<16x1xf32>
    %22 = arith.subf %21, %20 : vector<16x1xf32>
    %cst_6 = arith.constant 0.000000e+00 : f32
    %23 = vector.broadcast %cst_6 : f32 to vector<16x1xf32>
    %24 = arith.maximumf %22, %23 : vector<16x1xf32>
    %25 = math.absf %22 : vector<16x1xf32>
    %cst_7 = arith.constant 0.000000e+00 : f32
    %26 = vector.broadcast %cst_7 : f32 to vector<16x1xf32>
    %27 = arith.subf %26, %25 : vector<16x1xf32>
    %28 = math.exp %27 : vector<16x1xf32>
    %29 = math.log1p %28 : vector<16x1xf32>
    %30 = arith.addf %24, %29 : vector<16x1xf32>
    %31 = vector.shape_cast %30 : vector<16x1xf32> to vector<1x16x1xf32>
    %cst_8 = arith.constant dense<0.000000e+00> : vector<1xf32>
    %32 = vector.multi_reduction <add>, %31, %cst_8 [1, 2] : vector<1x16x1xf32> to vector<1xf32>
    %33 = vector.shape_cast %32 : vector<1xf32> to vector<1x1x1xf32>
    %34 = vector.extract %33[0, 0, 0] : f32 from vector<1x1x1xf32>
    %35 = vector.broadcast %34 : f32 to vector<1x1xf32>
    %36 = arith.addf %35, %18 : vector<1x1xf32>
    %cst_9 = arith.constant 6.250000e-02 : f32
    %37 = vector.broadcast %cst_9 : f32 to vector<1x1xf32>
    %38 = arith.mulf %36, %37 : vector<1x1xf32>
    %c0_10 = arith.constant 0 : index
    %c0_11 = arith.constant 0 : index
    %39 = vector.load %arg3[%c0_10, %c0_11] : memref<1x1xf32, #tpu.memory_space<vmem>>, vector<1x1xf32>
    tpu.vector_store %arg3[%c0_10, %c0_11], %38 {strides = array<i32>} : memref<1x1xf32, #tpu.memory_space<vmem>>, vector<1x1xf32>,
    return
  }
  func.func @transform_0(%arg0: i32) -> (i32, i32) {
    %c0_i32 = arith.constant 0 : i32
    %c0_i32_0 = arith.constant 0 : i32
    %c0_i32_1 = arith.constant 0 : i32
    return %c0_i32, %c0_i32_0 : i32, i32
  }
  func.func @transform_1(%arg0: i32) -> (i32, i32) {
    %c0_i32 = arith.constant 0 : i32
    %c0_i32_0 = arith.constant 0 : i32
    %c0_i32_1 = arith.constant 0 : i32
    return %c0_i32, %c0_i32_0 : i32, i32
  }
  func.func @transform_2(%arg0: i32) -> (i32, i32) {
    %c0_i32 = arith.constant 0 : i32
    %c0_i32_0 = arith.constant 0 : i32
    %c0_i32_1 = arith.constant 0 : i32
    return %c0_i32, %c0_i32_0 : i32, i32
  }
}

</mosaic_0001>

<bundles_post_ra>
// kernel: tpu_custom_call.1
= control target key start
LH: loop header
LB: loop body
LE: loop exit
PB: predicated region body
PF: predicated region fallthrough
CT: control target
= control target key end

     0   :  { %s222_s0 = inlined_call_operand.vmem [shape: f32[16,1], index: 0, kind: input, shape index: {}]   ;;  %s223_s1 = inlined_call_operand.vmem [shape: f32[16,128], index: 1, kind: input, shape index: {}]   ;;  %s224_s2 = inlined_call_operand.hbm [shape: f32[1,1], index: 2, kind: output, shape index: {}]  }
   0x1   :  { %v12_v0 = vld [vmem:[%s223_s1] sm:$0xff]  ;;  %v13_v1 = vld [vmem:[%s223_s1 + $0x8] sm:$0xff] }
   0x2   :  { %7 = vsyncpa [#allocation3], 0  ;;  %v14_v2 = vmul.f32 1.442695, %v12_v0  ;;  %v16_v3 = vmul.f32 1.442695, %v13_v1 }
   0x3   :  { %v65_v20 = vld [vmem:[%s222_s0] sm:$0xff]  ;;  %v66_v21 = vld [vmem:[%s222_s0 + $0x8] sm:$0xff]  ;;  %vm99_vm4 = vcmask 7168   ;;  %s182_s18 = smov [#allocation2]   ;;  %vm115_vm5 = vcmask 0  }
   0x4   :  { %138 = vpow2.f32 %v14_v2  ;;  %s123_s19 = sshll.u32 %s182_s18, 4  ;;  %s124_s19 = int_to_ptr.vmem [resolvable:$true] %s123_s19 }
   0x5   :  { %140 = vpow2.f32 %v16_v3  ;;  %s158_s20 = scalar_lea.vmem %s124_s19, 16  ;;  %s162_s21 = scalar_lea.vmem %s124_s19, 32 }
   0x6   :  { %p159_p0 = scmp.ne.s32.totalorder %s124_s19, %s158_s20  ;;  %p163_p1 = scmp.lt.s32.totalorder %s124_s19, %s124_s19 }
   0x7   :  { %p164_p2 = scmp.lt.s32.totalorder %s162_s21, %s158_s20 }
   0x9   :  { %p165_p3 = por %p164_p2, %p163_p1 }
   0xb   :  { %p166_p4 = pnand %p165_p3, %p159_p0 }
   0xe   :  { %v139_v4 = vpop.eup %138 }
   0xf   :  { %v141_v5 = vpop.eup %140 }
  0x10   :  { %v18_v6 = vadd.f32 %v141_v5, %v139_v4 }
  0x12   :  { %19 = vadd.xlane.f32.xlu0 %v18_v6 }
  0x9f   :  { %v20_v7 = vpop.xlane.xlu0 %19 }
  0xa0   :  { %v21_v8 = vrot.slane %v20_v7, 4 }
  0xa2   :  { %v22_v9 = vadd.f32 %v21_v8, %v20_v7 }
  0xa4   :  { %v23_v10 = vrot.slane %v22_v9, 2 }
  0xa6   :  { %v24_v11 = vadd.f32 %v23_v10, %v22_v9 }
  0xa8   :  { %v25_v12 = vrot.slane %v24_v11, 1 }
  0xaa   :  { %v26_v13 = vadd.f32 %v25_v12, %v24_v11 }
  0xac   :  { %131 = vpush %v26_v13 }
  0xdd   :  { %s132_s13 = spop %131 }
  0xde   :  { %v28_v14 = vstv %s132_s13 }
  0xdf   :  { %v29_v15 = vmul.f32 0.0625, %v28_v14 }
  0xe1   :  { %142 = vrcp.f32 %v29_v15 }
  0xe2   :  { %144 = vlog2.f32 %v29_v15 }
  0xeb   :  { %v143_v16 = vpop.eup %142 }
  0xec   :  { %v145_v17 = vpop.eup %144  ;;  %v32_v18 = vmul.f32 %v143_v16, %v139_v4  ;;  %v33_v19 = vmul.f32 %v143_v16, %v141_v5 }
  0xed   :  { %v64_v22 = vmul.f32 0.6931472, %v145_v17 }
  0xee   :  { %v34_v23 = vadd.f32 1.0, %v32_v18  ;;  %v43_v24 = vadd.f32 1.0, %v33_v19  ;;  %v37_v29 = vmul.f32 -0.5, %v32_v18  ;;  %v46_v30 = vmul.f32 -0.5, %v33_v19 }
  0xef   :  { %v67_v25 = vsub.f32 %v64_v22, %v65_v20  ;;  %v68_v26 = vsub.f32 %v64_v22, %v66_v21  ;;  %v40_v36 = vand.u32 2147483647, %v32_v18  ;;  %v49_v38 = vand.u32 2147483647, %v33_v19 }
  0xf0   :  { %146 = vlog2.f32 %v34_v23  ;;  %v38_v35 = vadd.f32 1.0, %v37_v29  ;;  %v47_v37 = vadd.f32 1.0, %v46_v30 }
  0xf1   :  { %148 = vlog2.f32 %v43_v24  ;;  %v71_v27 = vand.u32 2147483647, %v67_v25  ;;  %v72_v28 = vand.u32 2147483647, %v68_v26  ;;  %vm41_vm0 = vcmp.lt.f32.partialorder %v40_v36, 0.0004427343 }
  0xf2   :  { %v39_v42 = vmul.f32 %v38_v35, %v32_v18  ;;  %v48_v44 = vmul.f32 %v47_v37, %v33_v19  ;;  %vm50_vm1 = vcmp.lt.f32.partialorder %v49_v38, 0.0004427343  ;;  %v69_v62 = vmax.f32 %v67_v25, 0.0 }
  0xf3   :  { %v73_v31 = vsub.f32 0.0, %v71_v27  ;;  %v74_v32 = vsub.f32 0.0, %v72_v28  ;;  %v70_v1 = vmax.f32 %v68_v26, 0.0 }
  0xf5   :  { %v75_v33 = vmul.f32 1.442695, %v73_v31  ;;  %v77_v34 = vmul.f32 1.442695, %v74_v32 }
  0xf7   :  { %150 = vpow2.f32 %v75_v33 }
  0xf8   :  { %152 = vpow2.f32 %v77_v34 }
  0xfa   :  { %v147_v39 = vpop.eup %146 }
  0xfb   :  { %v149_v40 = vpop.eup %148  ;;  %v36_v41 = vmul.f32 0.6931472, %v147_v39 }
  0xfc   :  { %v45_v43 = vmul.f32 0.6931472, %v149_v40 }
  0xfd   :  { %v42_v45 = vsel %vm41_vm0, %v39_v42, %v36_v41 }
  0xfe   :  { %v51_v46 = vsel %vm50_vm1, %v48_v44, %v45_v43 }
  0xff   :  { %v52_v47 = vadd.f32 %v51_v46, %v42_v45 }
 0x101   :  { %53 = vadd.xlane.f32.xlu0 %v52_v47  ;;  %v151_v48 = vpop.eup %150 }
 0x102   :  { %v153_v49 = vpop.eup %152  ;;  %v79_v50 = vadd.f32 1.0, %v151_v48  ;;  %v82_v52 = vmul.f32 -0.5, %v151_v48  ;;  %v85_v55 = vand.u32 2147483647, %v151_v48 }
 0x103   :  { %v88_v51 = vadd.f32 1.0, %v153_v49  ;;  %v91_v53 = vmul.f32 -0.5, %v153_v49  ;;  %v94_v57 = vand.u32 2147483647, %v153_v49 }
 0x104   :  { %154 = vlog2.f32 %v79_v50  ;;  %v83_v54 = vadd.f32 1.0, %v82_v52  ;;  %vm86_vm2 = vcmp.lt.f32.partialorder %v85_v55, 0.0004427343 }
 0x105   :  { %156 = vlog2.f32 %v88_v51  ;;  %v92_v56 = vadd.f32 1.0, %v91_v53  ;;  %vm95_vm3 = vcmp.lt.f32.partialorder %v94_v57, 0.0004427343 }
 0x106   :  { %v84_v61 = vmul.f32 %v151_v48, %v83_v54 }
 0x107   :  { %v93_v0 = vmul.f32 %v153_v49, %v92_v56 }
 0x10e   :  { %v155_v58 = vpop.eup %154 }
 0x10f   :  { %v157_v59 = vpop.eup %156  ;;  %v81_v60 = vmul.f32 0.6931472, %v155_v58 }
 0x110   :  { %v90_v63 = vmul.f32 0.6931472, %v157_v59 }
 0x111   :  { %v87_v2 = vsel %vm86_vm2, %v84_v61, %v81_v60 }
 0x112   :  { %v96_v3 = vsel %vm95_vm3, %v93_v0, %v90_v63  ;;  %v97_v4 = vadd.f32 %v87_v2, %v69_v62 }
 0x113   :  { %v98_v5 = vadd.f32 %v96_v3, %v70_v1 }
 0x114   :  { %v100_v6 = vsel %vm99_vm4, %v97_v4, 0.0 }
 0x115   :  { %v101_v7 = vsel %vm99_vm4, %v98_v5, 0.0 }
 0x116   :  { %v102_v8 = vadd.f32 %v101_v7, %v100_v6 }
 0x118   :  { %103 = vadd.xlane.f32.xlu1 %v102_v8 }
 0x18e   :  { %v54_v9 = vpop.xlane.xlu0 %53 }
 0x18f   :  { %v55_v10 = vrot.slane %v54_v9, 4 }
 0x191   :  { %v56_v11 = vadd.f32 %v55_v10, %v54_v9 }
 0x193   :  { %v57_v12 = vrot.slane %v56_v11, 2 }
 0x195   :  { %v58_v13 = vadd.f32 %v57_v12, %v56_v11 }
 0x197   :  { %v59_v14 = vrot.slane %v58_v13, 1 }
 0x199   :  { %v60_v15 = vadd.f32 %v59_v14, %v58_v13 }
 0x19b   :  { %133 = vpush %v60_v15 }
 0x1a5   :  { %v104_v16 = vpop.xlane.xlu1 %103 }
 0x1a6   :  { %v105_v17 = vrot.slane %v104_v16, 4 }
 0x1a8   :  { %v106_v18 = vadd.f32 %v105_v17, %v104_v16 }
 0x1aa   :  { %v107_v19 = vrot.slane %v106_v18, 2 }
 0x1ac   :  { %v108_v20 = vadd.f32 %v107_v19, %v106_v18 }
 0x1ae   :  { %v109_v21 = vrot.slane %v108_v20, 1 }
 0x1b0   :  { %v110_v22 = vadd.f32 %v109_v21, %v108_v20 }
 0x1b2   :  { %135 = vpush %v110_v22 }
 0x1cc   :  { %s134_s0 = spop %133 }
 0x1cd   :  { %v62_v23 = vstv %s134_s0 }
 0x1e3   :  { %s136_s17 = spop %135 }
 0x1e4   :  { %v112_v24 = vstv %s136_s17 }
 0x1e5   :  { %v113_v25 = vadd.f32 %v112_v24, %v62_v23 }
 0x1e7   :  { %v114_v26 = vmul.f32 0.0625, %v113_v25 }
 0x1e9   :  { %116 = vst.msk [vmem:[#allocation2] sm:$0x1] %vm115_vm5, %v114_v26 }
 0x1ea   :  { %169 = shalt.err (!%p166_p4)
}
 0x1eb   :  { %s170_s24 = scalar_lea.hbm %s224_s2, 16 }
 0x1ec   :  { %p171_p5 = scmp.ne.s32.totalorder %s224_s2, %s170_s24  ;;  %p174_p6 = scmp.lt.u32.totalorder %s170_s24, %s224_s2 }
 0x1ee   :  { %p176_p7 = pnand %p174_p6, %p171_p5 }
 0x1f0   :  { %179 = shalt.err (!%p176_p7)
}
 0x1f1   :  { %126 = dma.vmem_to_hbm [thread:$0]  %s124_s19, 16, %s224_s2, [#allocation3]  }
 0x1f2   :  { %180 = dma.done.wait [#allocation3], 16  }
 0x1f3   :  { %181 = vsyncadd [#allocation3], 4294967280 }
 0x1f4   :  { %130 = vsyncpa [#allocation3], 1 }

</bundles_post_ra>
